<compile_context>
chip_gen: v5e
topology: v5e:2x2
jax: 0.10.0
libtpu: 0.0.40
codegen_flags: <defaults>
</compile_context>

<pallas_src>
import functools
import math

import jax
import jax.numpy as jnp
from jax import lax
from jax.experimental import pallas as pl
from jax.experimental.pallas import tpu as pltpu


def _tpu_generation():
    """Best-effort TPU generation ('v5' | 'v6' | 'v7' | None)."""
    try:
        kind = jax.devices()[0].device_kind.lower()
    except Exception:
        return None
    for g in ("v7", "v6", "v5"):
        if g in kind:
            return g
    return None


# ---------------------------------------------------------------------------
# Fast path: table resident in VMEM, gather via one-hot MXU matmul.
# ---------------------------------------------------------------------------
def _vmem_onehot_kernel(ids_ref, emb_ref, out_ref, *, scale, vocab):
    ids = ids_ref[...]                                         # (tb, 1) int32
    tb = ids.shape[0]
    iota = lax.broadcasted_iota(jnp.int32, (tb, vocab), 1)     # (tb, V)
    onehot = (iota == ids).astype(emb_ref.dtype)               # (tb, V)
    gathered = jnp.dot(onehot, emb_ref[...],
                       preferred_element_type=jnp.float32)     # (tb, D) f32
    out_ref[...] = (gathered * scale).astype(out_ref.dtype)


def _token_embedding_vmem(ids_flat, emb_table, scale, tok_block=256):
    # tok_block=256 fills the 256-wide MXU on v6e/v7x and halves grid steps.
    N = ids_flat.shape[0]
    V, D = emb_table.shape
    itemsize = jnp.dtype(emb_table.dtype).itemsize
    gen = _tpu_generation()

    n_blocks = -(-N // tok_block)
    n_pad = n_blocks * tok_block
    ids_pad = jnp.pad(ids_flat, (0, n_pad - N)).reshape(n_pad, 1)

    kernel = functools.partial(_vmem_onehot_kernel, scale=scale, vocab=V)

    # VMEM budget: resident table (x2 worst case), (tb, V) f32 one-hot
    # intermediate, double-buffered output block, plus headroom.
    table_bytes = V * D * itemsize
    onehot_bytes = tok_block * V * 4
    out_bytes = 2 * tok_block * D * itemsize
    vmem_cap = (48 << 20) if gen == "v7" else (100 << 20)
    vmem_limit = int(min(max(2 * table_bytes + onehot_bytes + out_bytes + (4 << 20),
                             32 << 20), vmem_cap))
    params = pltpu.CompilerParams(dimension_semantics=("parallel",),
                                  vmem_limit_bytes=vmem_limit)

    def build(table_spec):
        return pl.pallas_call(
            kernel,
            out_shape=jax.ShapeDtypeStruct((n_pad, D), emb_table.dtype),
            grid=(n_blocks,),
            in_specs=[pl.BlockSpec((tok_block, 1), lambda i: (i, 0)),
                      table_spec],
            out_specs=pl.BlockSpec((tok_block, D), lambda i: (i, 0)),
            compiler_params=params,
        )

    try:
        # Constant index_map -> table is resident; single-buffer it so we do
        # not waste table_bytes of VMEM on a pointless second buffer.
        resident_spec = pl.BlockSpec((V, D), lambda i: (0, 0),
                                     pipeline_mode=pl.Buffered(1))
        out = build(resident_spec)(ids_pad, emb_table)
    except Exception:
        # Buffered(1) not supported by this JAX version -> default spec.
        out = build(pl.BlockSpec((V, D), lambda i: (0, 0)))(ids_pad, emb_table)
    return out[:N]


# ---------------------------------------------------------------------------
# Large-vocab path: table in HBM, manual row-gather DMAs, 2-deep prefetch.
# ---------------------------------------------------------------------------
def _hbm_gather_kernel(ids_ref, emb_hbm, out_ref, row_buf, sems, *,
                       scale, tok_block, n_inner):
    """
    ids_ref : SMEM, (n_pad,) int32 (scalar-prefetched token ids)
    emb_hbm : HBM ref, (V, D)       (memory_space=pl.ANY)
    out_ref : VMEM, (tok_block, D)
    row_buf : VMEM scratch, (2, tok_block, D)   -- 2-slot gather buffer
    sems    : DMA semaphores, (2,)              -- one per slot
    """
    o = pl.program_id(0)
    i = pl.program_id(1)
    blk = o * n_inner + i
    cur = i % 2                      # double-buffer slot for this inner step

    def issue(block_idx, slot):
        # Hoisted base + multiple_of hint keeps scalar-side address math
        # off the descriptor-issue critical path.
        base = pl.multiple_of(block_idx * tok_block, tok_block)

        def body(t, carry):
            tok = ids_ref[base + t]
            pltpu.make_async_copy(emb_hbm.at[tok],
                                  row_buf.at[slot, t],
                                  sems.at[slot]).start()
            return carry

        lax.fori_loop(0, tok_block, body, 0, unroll=16)

    # Prime the pipeline once per outer index (inner axis runs sequentially
    # on one core, so this is megacore-safe).
    @pl.when(i == 0)
    def _():
        issue(blk, cur)

    # 2-deep prefetch: start the next block's row gather into the other slot
    # before waiting on the current slot.
    @pl.when(i + 1 < n_inner)
    def _():
        issue(blk + 1, 1 - cur)

    # Aggregate wait: DMA semaphores count bytes, so one wait whose descriptor
    # covers the whole (tok_block, D) slot retires all tok_block row copies
    # issued onto sems.at[cur] (replaces the old tok_block-deep wait loop).
    pltpu.make_async_copy(row_buf.at[cur], row_buf.at[cur], sems.at[cur]).wait()

    rows = row_buf[cur].astype(jnp.float32)
    out_ref[...] = (rows * scale).astype(out_ref.dtype)


def _token_embedding_hbm_chunk(ids_flat, emb_table, scale, tok_block):
    N = ids_flat.shape[0]
    V, D = emb_table.shape
    itemsize = jnp.dtype(emb_table.dtype).itemsize
    gen = _tpu_generation()

    if tok_block is None:
        # ~2 MiB of gather scratch per slot: amortizes the ~0.35 us fixed
        # per-grid-step cost and the per-outer-index pipeline prime.
        slot_budget = 2 << 20
        tok_block = (slot_budget // max(D * itemsize, 1)) // 8 * 8
        tok_block = max(8, min(4096, tok_block))
    # Multiple of 8, and never (much) bigger than the token count.
    tok_block = max(8, (int(tok_block) // 8) * 8)
    tok_block = min(tok_block, max(8, -(-N // 8) * 8))

    n_blocks = -(-N // tok_block)
    # Only v7x has 2 TensorCores; on v5e/v6e an outer split is a serial loop
    # that just adds a second pipeline prime and extra padded-block DMAs.
    # TODO(synk): on v7x, pltpu.CORE_PARALLEL on the outer axis would
    # guarantee the cross-TC split; kept plain "parallel" for portability.
    n_outer = 2 if (gen == "v7" and n_blocks >= 2) else 1
    n_inner = -(-n_blocks // n_outer)
    n_pad = n_outer * n_inner * tok_block
    ids_pad = jnp.pad(ids_flat, (0, n_pad - N))  # pad with id 0 (valid row)

    kernel = functools.partial(_hbm_gather_kernel, scale=scale,
                               tok_block=tok_block, n_inner=n_inner)

    grid_spec = pltpu.PrefetchScalarGridSpec(
        num_scalar_prefetch=1,                               # ids -> SMEM
        grid=(n_outer, n_inner),
        in_specs=[pl.BlockSpec(memory_space=pl.ANY)],        # table stays in HBM
        out_specs=pl.BlockSpec((tok_block, D),
                               lambda o, i, ids_r: (o * n_inner + i, 0)),
        scratch_shapes=[
            pltpu.VMEM((2, tok_block, D), emb_table.dtype),  # 2-slot gather buf
            pltpu.SemaphoreType.DMA((2,)),                   # one sem per slot
        ],
    )

    # 2 gather slots + double-buffered output block, plus headroom.
    vmem_need = 4 * tok_block * D * itemsize
    vmem_cap = (48 << 20) if gen == "v7" else (96 << 20)
    vmem_limit = int(min(max(vmem_need + (8 << 20), 32 << 20), vmem_cap))

    out = pl.pallas_call(
        kernel,
        out_shape=jax.ShapeDtypeStruct((n_pad, D), emb_table.dtype),
        grid_spec=grid_spec,
        compiler_params=pltpu.CompilerParams(
            dimension_semantics=("parallel", "arbitrary"),
            vmem_limit_bytes=vmem_limit,
        ),
    )(ids_pad, emb_table)
    return out[:N]


# Keep the scalar-prefetched ids comfortably inside SMEM (1-D SMEM arrays pad
# to next_pow2(4N) bytes), by chunking very long token streams.
_MAX_TOKENS_PER_CALL = 16384


def _token_embedding_hbm(ids_flat, emb_table, scale, tok_block=None):
    N = ids_flat.shape[0]
    if N <= _MAX_TOKENS_PER_CALL:
        return _token_embedding_hbm_chunk(ids_flat, emb_table, scale, tok_block)
    outs = []
    for s in range(0, N, _MAX_TOKENS_PER_CALL):
        outs.append(_token_embedding_hbm_chunk(
            ids_flat[s:s + _MAX_TOKENS_PER_CALL], emb_table, scale, tok_block))
    return jnp.concatenate(outs, axis=0)


# ---------------------------------------------------------------------------
# Public wrapper: TokenEmbedding.forward equivalent.
# ---------------------------------------------------------------------------
def token_embedding(token_ids, emb_table, *, force_hbm=False, tok_block=None):
    """token_ids: (B, S) int; emb_table: (V, D) -> (B, S, D) = emb[ids] * sqrt(D)."""
    B, S = token_ids.shape
    V, D = emb_table.shape
    N = B * S
    scale = math.sqrt(float(D))

    # Clamp so an out-of-range id can never DMA from an arbitrary HBM offset.
    ids_flat = jnp.clip(token_ids.reshape(N).astype(jnp.int32), 0, V - 1)

    gen = _tpu_generation()
    if gen == "v7":
        resident_cap = 8 << 20      # 64 MiB physical VMEM -> stay conservative
    elif gen in ("v5", "v6"):
        resident_cap = 16 << 20     # 128 MiB physical VMEM
    else:
        resident_cap = 4 << 20
    table_bytes = V * D * jnp.dtype(emb_table.dtype).itemsize

    if (not force_hbm) and table_bytes <= resident_cap and V <= 8192:
        out = _token_embedding_vmem(ids_flat, emb_table, scale)
    else:
        out = _token_embedding_hbm(ids_flat, emb_table, scale, tok_block)
    return out.reshape(B, S, D)


if __name__ == "__main__":
    # Small shapes consistent with the module: (batch, seq) token ids.
    batch, seq = 2, 8
    vocab_size, d_model = 64, 128

    key = jax.random.PRNGKey(0)
    k_ids, k_emb = jax.random.split(key)

    # nn.Embedding default init is N(0, 1).
    emb_table = jax.random.normal(k_emb, (vocab_size, d_model), dtype=jnp.float32)
    token_ids = jax.random.randint(k_ids, (batch, seq), 0, vocab_size, dtype=jnp.int32)

    out = jax.block_until_ready(token_embedding(token_ids, emb_table))
    ref = emb_table[token_ids] * math.sqrt(float(d_model))
    assert out.shape == (batch, seq, d_model), out.shape
    assert jnp.allclose(out, ref, atol=1e-5, rtol=1e-5), "VMEM path mismatch"

    # Exercise the HBM gather path (manual row DMAs, aggregate byte-count
    # wait, 2-deep cross-step prefetch) with a multi-block grid ...
    Vb, Db, Bb, Sb = 1024, 128, 2, 512
    k1, k2 = jax.random.split(jax.random.PRNGKey(1))
    big_table = jax.random.normal(k1, (Vb, Db), dtype=jnp.float32)
    big_ids = jax.random.randint(k2, (Bb, Sb), 0, Vb, dtype=jnp.int32)
    ref2 = big_table[big_ids] * math.sqrt(float(Db))

    out2 = jax.block_until_ready(
        token_embedding(big_ids, big_table, force_hbm=True, tok_block=128))
    assert out2.shape == (Bb, Sb, Db), out2.shape
    assert jnp.allclose(out2, ref2, atol=1e-5, rtol=1e-5), "HBM path mismatch"

    # ... and once more with the default (VMEM-budgeted) block size, which
    # collapses to a single grid step here and tests the no-lookahead edge.
    out3 = jax.block_until_ready(
        token_embedding(big_ids, big_table, force_hbm=True))
    assert jnp.allclose(out3, ref2, atol=1e-5, rtol=1e-5), "HBM default-block mismatch"

    print("KERNEL_OK")
</pallas_src>

<mosaic_0001>
module attributes {stable_mosaic.version = 11 : i64} {
  func.func @_vmem_onehot_kernel(%arg0: i32, %arg1: memref<256x1xi32, #tpu.memory_space<vmem>>, %arg2: memref<64x128xf32, #tpu.memory_space<vmem>>, %arg3: memref<256x128xf32, #tpu.memory_space<vmem>>) attributes {dimension_semantics = [#tpu.dimension_semantics<parallel>], iteration_bounds = array<i64: 1>, scalar_prefetch = 0 : i64, scratch_operands = 0 : i64, tpu.core_type = #tpu.core_type<tc>, window_params = [{transform_indices = @transform_0, window_bounds = array<i64: 256, 1>}, {pipeline_mode = #tpu.pipeline_mode<synchronous>, transform_indices = @transform_1, window_bounds = array<i64: 64, 128>}, {transform_indices = @transform_2, window_bounds = array<i64: 256, 128>}]} {
    %c0 = arith.constant 0 : index
    %c0_0 = arith.constant 0 : index
    %0 = vector.load %arg1[%c0, %c0_0] : memref<256x1xi32, #tpu.memory_space<vmem>>, vector<256x1xi32>
    %1 = tpu.iota {dimensions = array<i32: 1>} : vector<256x64xi32>
    %2 = vector.broadcast %0 : vector<256x1xi32> to vector<256x64xi32>
    %3 = arith.cmpi eq, %1, %2 : vector<256x64xi32>
    %4 = arith.extui %3 : vector<256x64xi1> to vector<256x64xi32>
    %5 = arith.sitofp %4 : vector<256x64xi32> to vector<256x64xf32>
    %c0_1 = arith.constant 0 : index
    %c0_2 = arith.constant 0 : index
    %6 = vector.load %arg2[%c0_1, %c0_2] : memref<64x128xf32, #tpu.memory_space<vmem>>, vector<64x128xf32>
    %cst = arith.constant dense<0.000000e+00> : vector<256x128xf32>
    %7 = tpu.matmul %5, %6, %cst {dimension_numbers = #tpu.dot_dimension_numbers<[1], [0], [0], [1], [0, 0, 1, 1], [], []>} : vector<256x64xf32>, vector<64x128xf32>, vector<256x128xf32> -> vector<256x128xf32>
    %cst_3 = arith.constant 11.3137083 : f32
    %8 = vector.broadcast %cst_3 : f32 to vector<256x128xf32>
    %9 = arith.mulf %7, %8 : vector<256x128xf32>
    %c0_4 = arith.constant 0 : index
    %c0_5 = arith.constant 0 : index
    %10 = vector.load %arg3[%c0_4, %c0_5] : memref<256x128xf32, #tpu.memory_space<vmem>>, vector<256x128xf32>
    tpu.vector_store %arg3[%c0_4, %c0_5], %9 {strides = array<i32>} : memref<256x128xf32, #tpu.memory_space<vmem>>, vector<256x128xf32>,
    return
  }
  func.func @transform_0(%arg0: i32) -> (i32, i32) {
    %c0_i32 = arith.constant 0 : i32
    %c0_i32_0 = arith.constant 0 : i32
    return %arg0, %c0_i32 : i32, i32
  }
  func.func @transform_1(%arg0: i32) -> (i32, i32) {
    %c0_i32 = arith.constant 0 : i32
    %c0_i32_0 = arith.constant 0 : i32
    %c0_i32_1 = arith.constant 0 : i32
    return %c0_i32, %c0_i32_0 : i32, i32
  }
  func.func @transform_2(%arg0: i32) -> (i32, i32) {
    %c0_i32 = arith.constant 0 : i32
    %c0_i32_0 = arith.constant 0 : i32
    return %arg0, %c0_i32 : i32, i32
  }
}

module attributes {stable_mosaic.version = 11 : i64} {
  func.func @_vmem_onehot_kernel(%arg0: i32, %arg1: memref<256x1xi32, #tpu.memory_space<vmem>>, %arg2: memref<64x128xf32, #tpu.memory_space<vmem>>, %arg3: memref<256x128xf32, #tpu.memory_space<vmem>>) attributes {dimension_semantics = [#tpu.dimension_semantics<parallel>], iteration_bounds = array<i64: 1>, scalar_prefetch = 0 : i64, scratch_operands = 0 : i64, tpu.core_type = #tpu.core_type<tc>, window_params = [{transform_indices = @transform_0, window_bounds = array<i64: 256, 1>}, {pipeline_mode = #tpu.pipeline_mode<synchronous>, transform_indices = @transform_1, window_bounds = array<i64: 64, 128>}, {transform_indices = @transform_2, window_bounds = array<i64: 256, 128>}]} {
    %c0 = arith.constant 0 : index
    %c0_0 = arith.constant 0 : index
    %0 = vector.load %arg1[%c0, %c0_0] : memref<256x1xi32, #tpu.memory_space<vmem>>, vector<256x1xi32>
    %1 = tpu.iota {dimensions = array<i32: 1>} : vector<256x64xi32>
    %2 = vector.broadcast %0 : vector<256x1xi32> to vector<256x64xi32>
    %3 = arith.cmpi eq, %1, %2 : vector<256x64xi32>
    %4 = arith.extui %3 : vector<256x64xi1> to vector<256x64xi32>
    %5 = arith.sitofp %4 : vector<256x64xi32> to vector<256x64xf32>
    %c0_1 = arith.constant 0 : index
    %c0_2 = arith.constant 0 : index
    %6 = vector.load %arg2[%c0_1, %c0_2] : memref<64x128xf32, #tpu.memory_space<vmem>>, vector<64x128xf32>
    %cst = arith.constant dense<0.000000e+00> : vector<256x128xf32>
    %7 = tpu.matmul %5, %6, %cst {dimension_numbers = #tpu.dot_dimension_numbers<[1], [0], [0], [1], [0, 0, 1, 1], [], []>} : vector<256x64xf32>, vector<64x128xf32>, vector<256x128xf32> -> vector<256x128xf32>
    %cst_3 = arith.constant 11.3137083 : f32
    %8 = vector.broadcast %cst_3 : f32 to vector<256x128xf32>
    %9 = arith.mulf %7, %8 : vector<256x128xf32>
    %c0_4 = arith.constant 0 : index
    %c0_5 = arith.constant 0 : index
    %10 = vector.load %arg3[%c0_4, %c0_5] : memref<256x128xf32, #tpu.memory_space<vmem>>, vector<256x128xf32>
    tpu.vector_store %arg3[%c0_4, %c0_5], %9 {strides = array<i32>} : memref<256x128xf32, #tpu.memory_space<vmem>>, vector<256x128xf32>,
    return
  }
  func.func @transform_0(%arg0: i32) -> (i32, i32) {
    %c0_i32 = arith.constant 0 : i32
    %c0_i32_0 = arith.constant 0 : i32
    return %arg0, %c0_i32 : i32, i32
  }
  func.func @transform_1(%arg0: i32) -> (i32, i32) {
    %c0_i32 = arith.constant 0 : i32
    %c0_i32_0 = arith.constant 0 : i32
    %c0_i32_1 = arith.constant 0 : i32
    return %c0_i32, %c0_i32_0 : i32, i32
  }
  func.func @transform_2(%arg0: i32) -> (i32, i32) {
    %c0_i32 = arith.constant 0 : i32
    %c0_i32_0 = arith.constant 0 : i32
    return %arg0, %c0_i32 : i32, i32
  }
}

</mosaic_0001>

<bundles_post_ra>
// kernel: tpu_custom_call.1
= control target key start
LH: loop header
LB: loop body
LE: loop exit
PB: predicated region body
PF: predicated region fallthrough
CT: control target
= control target key end

     0   :  { %v660_v3 = vmov 0   ;;  %s901_s0 = inlined_call_operand.vmem [shape: s32[256,1], index: 0, kind: input, shape index: {}]   ;;  %s902_s1 = inlined_call_operand.vmem [shape: f32[64,128], index: 1, kind: input, shape index: {}]   ;;  %s903_s2 = inlined_call_operand.hbm [shape: f32[256,128], index: 2, kind: output, shape index: {}]  }
   0x1   :  { %v29_v0 = vld [vmem:[%s901_s0 + $0x88] sm:$0xff]  ;;  %v28_v1 = vld [vmem:[%s901_s0 + $0x80] sm:$0xff]  ;;  %633 = vset.pattern.permute.xlu2 %v660_v3  ;;  %632 = vset.pattern.permute.xlu1 %v660_v3 }
   0x2   :  { %v12_v2 = vld [vmem:[%s901_s0] sm:$0xff]  ;;  %631 = vset.pattern.permute.xlu0 %v660_v3  ;;  %98 = vperm.xlu2 %633, %v29_v0  }
   0x3   :  { %95 = vperm.xlu0 %631, %v28_v1   ;;  %47 = vperm.xlu1 %632, %v12_v2  }
   0x4   :  { %7 = vsyncpa [#allocation3], 0  ;;  %v37_v4 = vld [vmem:[%s901_s0 + $0xc8] sm:$0xff]  ;;  %v36_v5 = vld [vmem:[%s901_s0 + $0xc0] sm:$0xff]  ;;  %v44_v43 = vlaneseq  ;;  %vm246_vm0 = vcmask 523264   ;;  %v661_v48 = vmov 0.0  }
   0x5   :  { %v20_v6 = vld [vmem:[%s901_s0 + $0x40] sm:$0xff]  ;;  %v30_v7 = vld [vmem:[%s901_s0 + $0x90] sm:$0xff]  ;;  %v13_v8 = vld [vmem:[%s901_s0 + $0x8] sm:$0xff]  ;;  %s526_s7 = sshll.u32 %s903_s2, 4  ;;  %s663_s8 = smov 128   ;;  %s527_s7 = int_to_ptr.hbm [resolvable:$true] %s526_s7 }
   0x6   :  { %v21_v9 = vld [vmem:[%s901_s0 + $0x48] sm:$0xff]  ;;  %v22_v10 = vld [vmem:[%s901_s0 + $0x50] sm:$0xff]  ;;  %v15_v13 = vld [vmem:[%s901_s0 + $0x18] sm:$0xff]  ;;  %v800_v44 = vand.u32 127, %v44_v43  ;;  %s664_s9 = smov 8  }
   0x7   :  { %v38_v11 = vld [vmem:[%s901_s0 + $0xd0] sm:$0xff]  ;;  %v31_v14 = vld [vmem:[%s901_s0 + $0x98] sm:$0xff]  ;;  %v40_v16 = vld [vmem:[%s901_s0 + $0xe0] sm:$0xff] }
   0x8   :  { %v14_v12 = vld [vmem:[%s901_s0 + $0x10] sm:$0xff]  ;;  %v39_v15 = vld [vmem:[%s901_s0 + $0xd8] sm:$0xff]  ;;  %v32_v18 = vld [vmem:[%s901_s0 + $0xa0] sm:$0xff] }
   0x9   :  { %v23_v17 = vld [vmem:[%s901_s0 + $0x58] sm:$0xff]  ;;  %v33_v19 = vld [vmem:[%s901_s0 + $0xa8] sm:$0xff]  ;;  %v16_v20 = vld [vmem:[%s901_s0 + $0x20] sm:$0xff] }
   0xa   :  { %122 = vperm.xlu2 %633, %v37_v4   ;;  %v24_v21 = vld [vmem:[%s901_s0 + $0x60] sm:$0xff]  ;;  %v25_v22 = vld [vmem:[%s901_s0 + $0x68] sm:$0xff]  ;;  %v18_v25 = vld [vmem:[%s901_s0 + $0x30] sm:$0xff] }
   0xb   :  { %119 = vperm.xlu0 %631, %v36_v5   ;;  %71 = vperm.xlu1 %632, %v20_v6   ;;  %v41_v23 = vld [vmem:[%s901_s0 + $0xe8] sm:$0xff]  ;;  %v34_v26 = vld [vmem:[%s901_s0 + $0xb0] sm:$0xff]  ;;  %v245_v28 = vld [vmem:[%s902_s1 + $0x38] sm:$0xff] }
   0xc   :  { %v17_v24 = vld [vmem:[%s901_s0 + $0x28] sm:$0xff]  ;;  %v42_v27 = vld [vmem:[%s901_s0 + $0xf0] sm:$0xff]  ;;  %v43_v30 = vld [vmem:[%s901_s0 + $0xf8] sm:$0xff]  ;;  %351 = vmatpush.msra.mxu0 %v245_v28  ;;  %603 = vmatpush.msra.mxu2 %v245_v28 }
   0xd   :  { %v244_v29 = vld [vmem:[%s902_s1 + $0x30] sm:$0xff]  ;;  %v35_v32 = vld [vmem:[%s901_s0 + $0xb8] sm:$0xff]  ;;  %602 = vmatpush.msra.mxu1 %v245_v28  ;;  %604 = vmatpush.msra.mxu3 %v245_v28  ;;  %v243_v33 = vld [vmem:[%s902_s1 + $0x28] sm:$0xff] }
   0xe   :  { %v26_v31 = vld [vmem:[%s901_s0 + $0x70] sm:$0xff]  ;;  %352 = vmatpush.msra.mxu0 %v244_v29  ;;  %606 = vmatpush.msra.mxu2 %v244_v29  ;;  %v242_v34 = vld [vmem:[%s902_s1 + $0x20] sm:$0xff]  ;;  %v241_v35 = vld [vmem:[%s902_s1 + $0x18] sm:$0xff] }
   0xf   :  { %605 = vmatpush.msra.mxu1 %v244_v29  ;;  %607 = vmatpush.msra.mxu3 %v244_v29  ;;  %v19_v36 = vld [vmem:[%s901_s0 + $0x38] sm:$0xff]  ;;  %v240_v38 = vld [vmem:[%s902_s1 + $0x10] sm:$0xff]  ;;  %v239_v39 = vld [vmem:[%s902_s1 + $0x8] sm:$0xff] }
  0x10   :  { %353 = vmatpush.msra.mxu0 %v243_v33  ;;  %609 = vmatpush.msra.mxu2 %v243_v33  ;;  %v27_v37 = vld [vmem:[%s901_s0 + $0x78] sm:$0xff]  ;;  %v238_v40 = vld [vmem:[%s902_s1] sm:$0xff]  ;;  %s662_s1 = smov [#allocation2]  }
  0x11   :  { %608 = vmatpush.msra.mxu1 %v243_v33  ;;  %610 = vmatpush.msra.mxu3 %v243_v33  ;;  %s524_s4 = sshll.u32 %s662_s1, 4  ;;  %s525_s4 = int_to_ptr.vmem [resolvable:$true] %s524_s4 }
  0x12   :  { %101 = vperm.xlu2 %633, %v30_v7   ;;  %354 = vmatpush.msra.mxu0 %v242_v34 }
  0x13   :  { %50 = vperm.xlu0 %631, %v13_v8   ;;  %74 = vperm.xlu1 %632, %v21_v9  }
  0x14   :  { %612 = vmatpush.msra.mxu2 %v242_v34  ;;  %611 = vmatpush.msra.mxu1 %v242_v34 }
  0x15   :  { %355 = vmatpush.msra.mxu0 %v241_v35  ;;  %613 = vmatpush.msra.mxu3 %v242_v34 }
  0x16   :  { %615 = vmatpush.msra.mxu2 %v241_v35  ;;  %614 = vmatpush.msra.mxu1 %v241_v35 }
  0x17   :  { %356 = vmatpush.msra.mxu0 %v240_v38  ;;  %616 = vmatpush.msra.mxu3 %v241_v35 }
  0x18   :  { %618 = vmatpush.msra.mxu2 %v240_v38  ;;  %617 = vmatpush.msra.mxu1 %v240_v38 }
  0x19   :  { %357 = vmatpush.msra.mxu0 %v239_v39  ;;  %619 = vmatpush.msra.mxu3 %v240_v38 }
  0x1a   :  { %77 = vperm.xlu2 %633, %v22_v10   ;;  %621 = vmatpush.msra.mxu2 %v239_v39 }
  0x1b   :  { %125 = vperm.xlu0 %631, %v38_v11   ;;  %53 = vperm.xlu1 %632, %v14_v12  }
  0x1c   :  { %620 = vmatpush.msra.mxu1 %v239_v39  ;;  %358 = vmatpush.msra.mxu0 %v238_v40 }
  0x1d   :  { %624 = vmatpush.msra.mxu2 %v238_v40  ;;  %622 = vmatpush.msra.mxu3 %v239_v39 }
  0x1e   :  { %623 = vmatpush.msra.mxu1 %v238_v40 }
  0x1f   :  { %625 = vmatpush.msra.mxu3 %v238_v40 }
  0x22   :  { %56 = vperm.xlu2 %633, %v15_v13  }
  0x23   :  { %104 = vperm.xlu0 %631, %v31_v14   ;;  %128 = vperm.xlu1 %632, %v39_v15  }
  0x2a   :  { %131 = vperm.xlu2 %633, %v40_v16  }
  0x2b   :  { %80 = vperm.xlu0 %631, %v23_v17   ;;  %107 = vperm.xlu1 %632, %v32_v18  }
  0x32   :  { %110 = vperm.xlu2 %633, %v33_v19  }
  0x33   :  { %59 = vperm.xlu0 %631, %v16_v20   ;;  %83 = vperm.xlu1 %632, %v24_v21  }
  0x3a   :  { %86 = vperm.xlu2 %633, %v25_v22  }
  0x3b   :  { %134 = vperm.xlu0 %631, %v41_v23   ;;  %62 = vperm.xlu1 %632, %v17_v24  }
  0x42   :  { %65 = vperm.xlu2 %633, %v18_v25  }
  0x43   :  { %113 = vperm.xlu0 %631, %v34_v26   ;;  %137 = vperm.xlu1 %632, %v42_v27  }
  0x4a   :  { %140 = vperm.xlu2 %633, %v43_v30  }
  0x4b   :  { %89 = vperm.xlu0 %631, %v26_v31   ;;  %116 = vperm.xlu1 %632, %v35_v32  }
  0x53   :  { %68 = vperm.xlu0 %631, %v19_v36   ;;  %92 = vperm.xlu1 %632, %v27_v37  }
  0x5c   :  { %v99_v41 = vpop.permute.xlu2 %98 }
  0x5d   :  { %vm159_vm3 = vcmp.eq.s32.totalorder %v800_v44, %v99_v41 }
  0x5e   :  { %v555_v54 = vsel %vm159_vm3, 1.0, %v661_v48 }
  0x64   :  { %v123_v42 = vpop.permute.xlu2 %122 }
  0x65   :  { %vm167_vm6 = vcmp.eq.s32.totalorder %v800_v44, %v123_v42 }
  0x66   :  { %v563_v61 = vsel %vm167_vm6, 1.0, %v661_v48 }
  0x6c   :  { %v102_v45 = vpop.permute.xlu2 %101 }
  0x6d   :  { %vm160_vm7 = vcmp.eq.s32.totalorder %v800_v44, %v102_v45 }
  0x6e   :  { %v556_v62 = vsel %vm160_vm7, 1.0, %v661_v48 }
  0x74   :  { %v78_v53 = vpop.permute.xlu2 %77 }
  0x75   :  { %v96_v46 = vpop.permute.xlu0 %95  ;;  %v48_v47 = vpop.permute.xlu1 %47  ;;  %vm152_vm10 = vcmp.eq.s32.totalorder %v800_v44, %v78_v53 }
  0x76   :  { %vm158_vm1 = vcmp.eq.s32.totalorder %v800_v44, %v96_v46  ;;  %vm142_vm2 = vcmp.eq.s32.totalorder %v800_v44, %v48_v47  ;;  %v548_v2 = vsel %vm152_vm10, 1.0, %v661_v48 }
  0x77   :  { %v554_v49 = vsel %vm158_vm1, 1.0, %v661_v48  ;;  %v538_v50 = vsel %vm142_vm2, 1.0, %v661_v48 }
  0x78   :  { %570 = vmatmul.msk.f32.vlgmr.msra.gmra.mxu0 %vm246_vm0, %v538_v50  ;;  %586 = vmatmul.msk.f32.vlgmr.msra.gmra.mxu2 %vm246_vm0, %v554_v49 }
  0x7c   :  { %v57_v63 = vpop.permute.xlu2 %56 }
  0x7d   :  { %v120_v51 = vpop.permute.xlu0 %119  ;;  %v72_v52 = vpop.permute.xlu1 %71  ;;  %vm145_vm13 = vcmp.eq.s32.totalorder %v800_v44, %v57_v63 }
  0x7e   :  { %vm166_vm4 = vcmp.eq.s32.totalorder %v800_v44, %v120_v51  ;;  %vm150_vm5 = vcmp.eq.s32.totalorder %v800_v44, %v72_v52  ;;  %v541_v8 = vsel %vm145_vm13, 1.0, %v661_v48 }
  0x7f   :  { %v562_v55 = vsel %vm166_vm4, 1.0, %v661_v48  ;;  %v546_v56 = vsel %vm150_vm5, 1.0, %v661_v48 }
  0x80   :  { %578 = vmatmul.msk.f32.vlgmr.msra.gmra.mxu1 %vm246_vm0, %v546_v56  ;;  %587 = vmatmul.msk.f32.gmra.mxu2 %vm246_vm0, %v555_v54 }
  0x81   :  { %594 = vmatmul.msk.f32.vlgmr.msra.gmra.mxu3 %vm246_vm0, %v562_v55 }
  0x84   :  { %v132_v5 = vpop.permute.xlu2 %131 }
  0x85   :  { %v51_v57 = vpop.permute.xlu0 %50  ;;  %v75_v58 = vpop.permute.xlu1 %74  ;;  %vm170_vm1 = vcmp.eq.s32.totalorder %v800_v44, %v132_v5 }
  0x86   :  { %vm143_vm8 = vcmp.eq.s32.totalorder %v800_v44, %v51_v57  ;;  %vm151_vm9 = vcmp.eq.s32.totalorder %v800_v44, %v75_v58  ;;  %v566_v16 = vsel %vm170_vm1, 1.0, %v661_v48 }
  0x87   :  { %v539_v59 = vsel %vm143_vm8, 1.0, %v661_v48  ;;  %v547_v60 = vsel %vm151_vm9, 1.0, %v661_v48 }
  0x88   :  { %571 = vmatmul.msk.f32.gmra.mxu0 %vm246_vm0, %v539_v59  ;;  %579 = vmatmul.msk.f32.gmra.mxu1 %vm246_vm0, %v547_v60 }
  0x89   :  { %588 = vmatmul.msk.f32.gmra.mxu2 %vm246_vm0, %v556_v62  ;;  %595 = vmatmul.msk.f32.gmra.mxu3 %vm246_vm0, %v563_v61 }
  0x8c   :  { %v111_v11 = vpop.permute.xlu2 %110 }
  0x8d   :  { %v126_v0 = vpop.permute.xlu0 %125  ;;  %v54_v1 = vpop.permute.xlu1 %53  ;;  %vm163_vm4 = vcmp.eq.s32.totalorder %v800_v44, %v111_v11 }
  0x8e   :  { %vm168_vm11 = vcmp.eq.s32.totalorder %v800_v44, %v126_v0  ;;  %vm144_vm12 = vcmp.eq.s32.totalorder %v800_v44, %v54_v1  ;;  %v559_v22 = vsel %vm163_vm4, 1.0, %v661_v48 }
  0x8f   :  { %v564_v3 = vsel %vm168_vm11, 1.0, %v661_v48  ;;  %v540_v4 = vsel %vm144_vm12, 1.0, %v661_v48 }
  0x90   :  { %572 = vmatmul.msk.f32.gmra.mxu0 %vm246_vm0, %v540_v4  ;;  %580 = vmatmul.msk.f32.gmra.mxu1 %vm246_vm0, %v548_v2 }
  0x91   :  { %596 = vmatmul.msk.f32.gmra.mxu3 %vm246_vm0, %v564_v3 }
  0x94   :  { %v87_v19 = vpop.permute.xlu2 %86 }
  0x95   :  { %v105_v6 = vpop.permute.xlu0 %104  ;;  %v129_v7 = vpop.permute.xlu1 %128  ;;  %vm155_vm7 = vcmp.eq.s32.totalorder %v800_v44, %v87_v19 }
  0x96   :  { %vm161_vm14 = vcmp.eq.s32.totalorder %v800_v44, %v105_v6  ;;  %vm169_vm15 = vcmp.eq.s32.totalorder %v800_v44, %v129_v7  ;;  %v551_v25 = vsel %vm155_vm7, 1.0, %v661_v48 }
  0x97   :  { %v557_v9 = vsel %vm161_vm14, 1.0, %v661_v48  ;;  %v565_v10 = vsel %vm169_vm15, 1.0, %v661_v48 }
  0x98   :  { %573 = vmatmul.msk.f32.gmra.mxu0 %vm246_vm0, %v541_v8  ;;  %589 = vmatmul.msk.f32.gmra.mxu2 %vm246_vm0, %v557_v9 }
  0x99   :  { %597 = vmatmul.msk.f32.gmra.mxu3 %vm246_vm0, %v565_v10 }
  0x9c   :  { %v66_v28 = vpop.permute.xlu2 %65 }
  0x9d   :  { %v81_v12 = vpop.permute.xlu0 %80  ;;  %v108_v13 = vpop.permute.xlu1 %107  ;;  %vm148_vm10 = vcmp.eq.s32.totalorder %v800_v44, %v66_v28 }
  0x9e   :  { %vm153_vm2 = vcmp.eq.s32.totalorder %v800_v44, %v81_v12  ;;  %vm162_vm3 = vcmp.eq.s32.totalorder %v800_v44, %v108_v13  ;;  %v544_v31 = vsel %vm148_vm10, 1.0, %v661_v48 }
  0x9f   :  { %v549_v14 = vsel %vm153_vm2, 1.0, %v661_v48  ;;  %v558_v15 = vsel %vm162_vm3, 1.0, %v661_v48 }
  0xa0   :  { %581 = vmatmul.msk.f32.gmra.mxu1 %vm246_vm0, %v549_v14  ;;  %590 = vmatmul.msk.f32.gmra.mxu2 %vm246_vm0, %v558_v15 }
  0xa1   :  { %598 = vmatmul.msk.f32.gmra.mxu3 %vm246_vm0, %v566_v16 }
  0xa4   :  { %v141_v34 = vpop.permute.xlu2 %140 }
  0xa5   :  { %v60_v17 = vpop.permute.xlu0 %59  ;;  %v84_v18 = vpop.permute.xlu1 %83  ;;  %vm173_vm13 = vcmp.eq.s32.totalorder %v800_v44, %v141_v34 }
  0xa6   :  { %vm146_vm5 = vcmp.eq.s32.totalorder %v800_v44, %v60_v17  ;;  %vm154_vm6 = vcmp.eq.s32.totalorder %v800_v44, %v84_v18  ;;  %v569_v39 = vsel %vm173_vm13, 1.0, %v661_v48 }
  0xa7   :  { %v542_v20 = vsel %vm146_vm5, 1.0, %v661_v48  ;;  %v550_v21 = vsel %vm154_vm6, 1.0, %v661_v48 }
  0xa8   :  { %574 = vmatmul.msk.f32.gmra.mxu0 %vm246_vm0, %v542_v20  ;;  %582 = vmatmul.msk.f32.gmra.mxu1 %vm246_vm0, %v550_v21 }
  0xa9   :  { %591 = vmatmul.msk.f32.gmra.mxu2 %vm246_vm0, %v559_v22 }
  0xad   :  { %v135_v23 = vpop.permute.xlu0 %134  ;;  %v63_v24 = vpop.permute.xlu1 %62 }
  0xae   :  { %vm171_vm8 = vcmp.eq.s32.totalorder %v800_v44, %v135_v23  ;;  %vm147_vm9 = vcmp.eq.s32.totalorder %v800_v44, %v63_v24 }
  0xaf   :  { %v567_v26 = vsel %vm171_vm8, 1.0, %v661_v48  ;;  %v543_v27 = vsel %vm147_vm9, 1.0, %v661_v48 }
  0xb0   :  { %575 = vmatmul.msk.f32.gmra.mxu0 %vm246_vm0, %v543_v27  ;;  %583 = vmatmul.msk.f32.gmra.mxu1 %vm246_vm0, %v551_v25 }
  0xb1   :  { %599 = vmatmul.msk.f32.gmra.mxu3 %vm246_vm0, %v567_v26 }
  0xb5   :  { %v114_v29 = vpop.permute.xlu0 %113  ;;  %v138_v30 = vpop.permute.xlu1 %137 }
  0xb6   :  { %vm164_vm11 = vcmp.eq.s32.totalorder %v800_v44, %v114_v29  ;;  %vm172_vm12 = vcmp.eq.s32.totalorder %v800_v44, %v138_v30 }
  0xb7   :  { %v560_v32 = vsel %vm164_vm11, 1.0, %v661_v48  ;;  %v568_v33 = vsel %vm172_vm12, 1.0, %v661_v48 }
  0xb8   :  { %576 = vmatmul.msk.f32.gmra.mxu0 %vm246_vm0, %v544_v31  ;;  %592 = vmatmul.msk.f32.gmra.mxu2 %vm246_vm0, %v560_v32 }
  0xb9   :  { %600 = vmatmul.msk.f32.gmra.mxu3 %vm246_vm0, %v568_v33 }
  0xbd   :  { %v90_v35 = vpop.permute.xlu0 %89  ;;  %v117_v36 = vpop.permute.xlu1 %116 }
  0xbe   :  { %vm156_vm14 = vcmp.eq.s32.totalorder %v800_v44, %v90_v35  ;;  %vm165_vm15 = vcmp.eq.s32.totalorder %v800_v44, %v117_v36 }
  0xbf   :  { %v552_v37 = vsel %vm156_vm14, 1.0, %v661_v48  ;;  %v561_v38 = vsel %vm165_vm15, 1.0, %v661_v48 }
  0xc0   :  { %584 = vmatmul.msk.f32.gmra.mxu1 %vm246_vm0, %v552_v37  ;;  %593 = vmatmul.msk.f32.gmra.mxu2 %vm246_vm0, %v561_v38 }
  0xc1   :  { %601 = vmatmul.msk.f32.gmra.mxu3 %vm246_vm0, %v569_v39 }
  0xc5   :  { %v69_v40 = vpop.permute.xlu0 %68  ;;  %v93_v41 = vpop.permute.xlu1 %92 }
  0xc6   :  { %vm149_vm1 = vcmp.eq.s32.totalorder %v800_v44, %v69_v40  ;;  %vm157_vm2 = vcmp.eq.s32.totalorder %v800_v44, %v93_v41 }
  0xc7   :  { %v545_v42 = vsel %vm149_vm1, 1.0, %v661_v48  ;;  %v553_v43 = vsel %vm157_vm2, 1.0, %v661_v48 }
  0xc8   :  { %577 = vmatmul.msk.f32.gmra.mxu0 %vm246_vm0, %v545_v42  ;;  %585 = vmatmul.msk.f32.gmra.mxu1 %vm246_vm0, %v553_v43 }
  0xf5   :  { %v360_v45 = vpop.f32.mrf.mxu0 }
  0xf6   :  { %v456_v46 = vmul.f32 11.313708, %v360_v45 }
  0xf8   :  { %488 = vst [vmem:[#allocation2] sm:$0xff] %v456_v46 }
  0xfb   :  { %v408_v47 = vpop.f32.mrf.mxu2 }
  0xfc   :  { %v472_v49 = vmul.f32 11.313708, %v408_v47 }
  0xfd   :  { %v384_v50 = vpop.f32.mrf.mxu1 }
  0xfe   :  { %504 = vst [vmem:[#allocation2 + $0x80] sm:$0xff] %v472_v49  ;;  %v464_v51 = vmul.f32 11.313708, %v384_v50 }
 0x100   :  { %496 = vst [vmem:[#allocation2 + $0x40] sm:$0xff] %v464_v51 }
 0x103   :  { %v411_v52 = vpop.f32.mrf.mxu2 }
 0x104   :  { %v473_v53 = vmul.f32 11.313708, %v411_v52  ;;  %v432_v44 = vpop.f32.mrf.mxu3 }
 0x105   :  { %v480_v54 = vmul.f32 11.313708, %v432_v44  ;;  %v363_v55 = vpop.f32.mrf.mxu0  ;;  %v387_v56 = vpop.f32.mrf.mxu1 }
 0x106   :  { %505 = vst [vmem:[#allocation2 + $0x88] sm:$0xff] %v473_v53  ;;  %v457_v48 = vmul.f32 11.313708, %v363_v55  ;;  %v465_v57 = vmul.f32 11.313708, %v387_v56 }
 0x107   :  { %512 = vst [vmem:[#allocation2 + $0xc0] sm:$0xff] %v480_v54 }
 0x108   :  { %489 = vst [vmem:[#allocation2 + $0x8] sm:$0xff] %v457_v48 }
 0x109   :  { %497 = vst [vmem:[#allocation2 + $0x48] sm:$0xff] %v465_v57 }
 0x10c   :  { %v414_v58 = vpop.f32.mrf.mxu2  ;;  %v435_v59 = vpop.f32.mrf.mxu3 }
 0x10d   :  { %v474_v60 = vmul.f32 11.313708, %v414_v58  ;;  %v481_v61 = vmul.f32 11.313708, %v435_v59  ;;  %v366_v62 = vpop.f32.mrf.mxu0  ;;  %v390_v63 = vpop.f32.mrf.mxu1 }
 0x10e   :  { %v458_v0 = vmul.f32 11.313708, %v366_v62  ;;  %v466_v1 = vmul.f32 11.313708, %v390_v63 }
 0x10f   :  { %506 = vst [vmem:[#allocation2 + $0x90] sm:$0xff] %v474_v60 }
 0x110   :  { %513 = vst [vmem:[#allocation2 + $0xc8] sm:$0xff] %v481_v61 }
 0x111   :  { %490 = vst [vmem:[#allocation2 + $0x10] sm:$0xff] %v458_v0 }
 0x112   :  { %498 = vst [vmem:[#allocation2 + $0x50] sm:$0xff] %v466_v1 }
 0x114   :  { %v438_v2 = vpop.f32.mrf.mxu3 }
 0x115   :  { %v482_v3 = vmul.f32 11.313708, %v438_v2  ;;  %v369_v4 = vpop.f32.mrf.mxu0 }
 0x116   :  { %v459_v5 = vmul.f32 11.313708, %v369_v4 }
 0x117   :  { %514 = vst [vmem:[#allocation2 + $0xd0] sm:$0xff] %v482_v3 }
 0x118   :  { %491 = vst [vmem:[#allocation2 + $0x18] sm:$0xff] %v459_v5 }
 0x11b   :  { %v417_v6 = vpop.f32.mrf.mxu2 }
 0x11c   :  { %v475_v7 = vmul.f32 11.313708, %v417_v6  ;;  %v441_v8 = vpop.f32.mrf.mxu3 }
 0x11d   :  { %v483_v9 = vmul.f32 11.313708, %v441_v8  ;;  %v393_v10 = vpop.f32.mrf.mxu1 }
 0x11e   :  { %507 = vst [vmem:[#allocation2 + $0x98] sm:$0xff] %v475_v7  ;;  %v467_v11 = vmul.f32 11.313708, %v393_v10 }
 0x11f   :  { %515 = vst [vmem:[#allocation2 + $0xd8] sm:$0xff] %v483_v9 }
 0x120   :  { %499 = vst [vmem:[#allocation2 + $0x58] sm:$0xff] %v467_v11 }
 0x123   :  { %v420_v12 = vpop.f32.mrf.mxu2 }
 0x124   :  { %v476_v13 = vmul.f32 11.313708, %v420_v12  ;;  %v444_v14 = vpop.f32.mrf.mxu3 }
 0x125   :  { %v484_v15 = vmul.f32 11.313708, %v444_v14  ;;  %v372_v16 = vpop.f32.mrf.mxu0  ;;  %v396_v17 = vpop.f32.mrf.mxu1 }
 0x126   :  { %508 = vst [vmem:[#allocation2 + $0xa0] sm:$0xff] %v476_v13  ;;  %v460_v18 = vmul.f32 11.313708, %v372_v16  ;;  %v468_v19 = vmul.f32 11.313708, %v396_v17 }
 0x127   :  { %516 = vst [vmem:[#allocation2 + $0xe0] sm:$0xff] %v484_v15 }
 0x128   :  { %492 = vst [vmem:[#allocation2 + $0x20] sm:$0xff] %v460_v18 }
 0x129   :  { %500 = vst [vmem:[#allocation2 + $0x60] sm:$0xff] %v468_v19 }
 0x12c   :  { %v423_v20 = vpop.f32.mrf.mxu2 }
 0x12d   :  { %v477_v21 = vmul.f32 11.313708, %v423_v20  ;;  %v375_v22 = vpop.f32.mrf.mxu0  ;;  %v399_v23 = vpop.f32.mrf.mxu1 }
 0x12e   :  { %v461_v24 = vmul.f32 11.313708, %v375_v22  ;;  %v469_v25 = vmul.f32 11.313708, %v399_v23 }
 0x12f   :  { %509 = vst [vmem:[#allocation2 + $0xa8] sm:$0xff] %v477_v21 }
 0x130   :  { %493 = vst [vmem:[#allocation2 + $0x28] sm:$0xff] %v461_v24 }
 0x131   :  { %501 = vst [vmem:[#allocation2 + $0x68] sm:$0xff] %v469_v25 }
 0x134   :  { %v447_v26 = vpop.f32.mrf.mxu3 }
 0x135   :  { %v485_v27 = vmul.f32 11.313708, %v447_v26  ;;  %v378_v28 = vpop.f32.mrf.mxu0 }
 0x136   :  { %v462_v29 = vmul.f32 11.313708, %v378_v28 }
 0x137   :  { %517 = vst [vmem:[#allocation2 + $0xe8] sm:$0xff] %v485_v27 }
 0x138   :  { %494 = vst [vmem:[#allocation2 + $0x30] sm:$0xff] %v462_v29 }
 0x13b   :  { %v426_v30 = vpop.f32.mrf.mxu2 }
 0x13c   :  { %v478_v31 = vmul.f32 11.313708, %v426_v30  ;;  %v450_v32 = vpop.f32.mrf.mxu3 }
 0x13d   :  { %v486_v33 = vmul.f32 11.313708, %v450_v32  ;;  %v402_v34 = vpop.f32.mrf.mxu1 }
 0x13e   :  { %510 = vst [vmem:[#allocation2 + $0xb0] sm:$0xff] %v478_v31  ;;  %v470_v35 = vmul.f32 11.313708, %v402_v34 }
 0x13f   :  { %518 = vst [vmem:[#allocation2 + $0xf0] sm:$0xff] %v486_v33 }
 0x140   :  { %502 = vst [vmem:[#allocation2 + $0x70] sm:$0xff] %v470_v35 }
 0x143   :  { %v429_v36 = vpop.f32.mrf.mxu2 }
 0x144   :  { %v479_v37 = vmul.f32 11.313708, %v429_v36  ;;  %v453_v38 = vpop.f32.mrf.mxu3 }
 0x145   :  { %v487_v39 = vmul.f32 11.313708, %v453_v38  ;;  %v381_v40 = vpop.f32.mrf.mxu0  ;;  %v405_v41 = vpop.f32.mrf.mxu1 }
 0x146   :  { %511 = vst [vmem:[#allocation2 + $0xb8] sm:$0xff] %v479_v37  ;;  %v463_v42 = vmul.f32 11.313708, %v381_v40  ;;  %v471_v43 = vmul.f32 11.313708, %v405_v41 }
 0x147   :  { %519 = vst [vmem:[#allocation2 + $0xf8] sm:$0xff] %v487_v39 }
 0x148   :  { %495 = vst [vmem:[#allocation2 + $0x38] sm:$0xff] %v463_v42 }
 0x149   :  { %503 = vst [vmem:[#allocation2 + $0x78] sm:$0xff] %v471_v43 }
 0x14a   :  { %532 = dma.vmem_to_hbm [thread:$0]  %s525_s4, 4096, %s527_s7, [#allocation3], %s663_s8, %s663_s8, %s664_s9  }
 0x14b   :  { %658 = dma.done.wait [#allocation3], 4096  }
 0x14c   :  { %659 = vsyncadd [#allocation3], 4294963200 }
 0x14d   :  { %537 = vsyncpa [#allocation3], 1 }

// kernel: tpu_custom_call.1
= control target key start
LH: loop header
LB: loop body
LE: loop exit
PB: predicated region body
PF: predicated region fallthrough
CT: control target
= control target key end

     0   :  { %v660_v3 = vmov 0   ;;  %s901_s0 = inlined_call_operand.vmem [shape: s32[256,1], index: 0, kind: input, shape index: {}]   ;;  %s902_s1 = inlined_call_operand.vmem [shape: f32[64,128], index: 1, kind: input, shape index: {}]   ;;  %s903_s2 = inlined_call_operand.hbm [shape: f32[256,128], index: 2, kind: output, shape index: {}]  }
   0x1   :  { %v29_v0 = vld [vmem:[%s901_s0 + $0x88] sm:$0xff]  ;;  %v28_v1 = vld [vmem:[%s901_s0 + $0x80] sm:$0xff]  ;;  %633 = vset.pattern.permute.xlu2 %v660_v3  ;;  %632 = vset.pattern.permute.xlu1 %v660_v3 }
   0x2   :  { %v12_v2 = vld [vmem:[%s901_s0] sm:$0xff]  ;;  %631 = vset.pattern.permute.xlu0 %v660_v3  ;;  %98 = vperm.xlu2 %633, %v29_v0  }
   0x3   :  { %95 = vperm.xlu0 %631, %v28_v1   ;;  %47 = vperm.xlu1 %632, %v12_v2  }
   0x4   :  { %7 = vsyncpa [#allocation3], 0  ;;  %v37_v4 = vld [vmem:[%s901_s0 + $0xc8] sm:$0xff]  ;;  %v36_v5 = vld [vmem:[%s901_s0 + $0xc0] sm:$0xff]  ;;  %v44_v43 = vlaneseq  ;;  %vm246_vm0 = vcmask 523264   ;;  %v661_v48 = vmov 0.0  }
   0x5   :  { %v20_v6 = vld [vmem:[%s901_s0 + $0x40] sm:$0xff]  ;;  %v30_v7 = vld [vmem:[%s901_s0 + $0x90] sm:$0xff]  ;;  %v13_v8 = vld [vmem:[%s901_s0 + $0x8] sm:$0xff]  ;;  %s526_s7 = sshll.u32 %s903_s2, 4  ;;  %s663_s8 = smov 128   ;;  %s527_s7 = int_to_ptr.hbm [resolvable:$true] %s526_s7 }
   0x6   :  { %v21_v9 = vld [vmem:[%s901_s0 + $0x48] sm:$0xff]  ;;  %v22_v10 = vld [vmem:[%s901_s0 + $0x50] sm:$0xff]  ;;  %v15_v13 = vld [vmem:[%s901_s0 + $0x18] sm:$0xff]  ;;  %v800_v44 = vand.u32 127, %v44_v43  ;;  %s664_s9 = smov 8  }
   0x7   :  { %v38_v11 = vld [vmem:[%s901_s0 + $0xd0] sm:$0xff]  ;;  %v31_v14 = vld [vmem:[%s901_s0 + $0x98] sm:$0xff]  ;;  %v40_v16 = vld [vmem:[%s901_s0 + $0xe0] sm:$0xff] }
   0x8   :  { %v14_v12 = vld [vmem:[%s901_s0 + $0x10] sm:$0xff]  ;;  %v39_v15 = vld [vmem:[%s901_s0 + $0xd8] sm:$0xff]  ;;  %v32_v18 = vld [vmem:[%s901_s0 + $0xa0] sm:$0xff] }
   0x9   :  { %v23_v17 = vld [vmem:[%s901_s0 + $0x58] sm:$0xff]  ;;  %v33_v19 = vld [vmem:[%s901_s0 + $0xa8] sm:$0xff]  ;;  %v16_v20 = vld [vmem:[%s901_s0 + $0x20] sm:$0xff] }
   0xa   :  { %122 = vperm.xlu2 %633, %v37_v4   ;;  %v24_v21 = vld [vmem:[%s901_s0 + $0x60] sm:$0xff]  ;;  %v25_v22 = vld [vmem:[%s901_s0 + $0x68] sm:$0xff]  ;;  %v18_v25 = vld [vmem:[%s901_s0 + $0x30] sm:$0xff] }
   0xb   :  { %119 = vperm.xlu0 %631, %v36_v5   ;;  %71 = vperm.xlu1 %632, %v20_v6   ;;  %v41_v23 = vld [vmem:[%s901_s0 + $0xe8] sm:$0xff]  ;;  %v34_v26 = vld [vmem:[%s901_s0 + $0xb0] sm:$0xff]  ;;  %v245_v28 = vld [vmem:[%s902_s1 + $0x38] sm:$0xff] }
   0xc   :  { %v17_v24 = vld [vmem:[%s901_s0 + $0x28] sm:$0xff]  ;;  %v42_v27 = vld [vmem:[%s901_s0 + $0xf0] sm:$0xff]  ;;  %v43_v30 = vld [vmem:[%s901_s0 + $0xf8] sm:$0xff]  ;;  %351 = vmatpush.msra.mxu0 %v245_v28  ;;  %603 = vmatpush.msra.mxu2 %v245_v28 }
   0xd   :  { %v244_v29 = vld [vmem:[%s902_s1 + $0x30] sm:$0xff]  ;;  %v35_v32 = vld [vmem:[%s901_s0 + $0xb8] sm:$0xff]  ;;  %602 = vmatpush.msra.mxu1 %v245_v28  ;;  %604 = vmatpush.msra.mxu3 %v245_v28  ;;  %v243_v33 = vld [vmem:[%s902_s1 + $0x28] sm:$0xff] }
   0xe   :  { %v26_v31 = vld [vmem:[%s901_s0 + $0x70] sm:$0xff]  ;;  %352 = vmatpush.msra.mxu0 %v244_v29  ;;  %606 = vmatpush.msra.mxu2 %v244_v29  ;;  %v242_v34 = vld [vmem:[%s902_s1 + $0x20] sm:$0xff]  ;;  %v241_v35 = vld [vmem:[%s902_s1 + $0x18] sm:$0xff] }
   0xf   :  { %605 = vmatpush.msra.mxu1 %v244_v29  ;;  %607 = vmatpush.msra.mxu3 %v244_v29  ;;  %v19_v36 = vld [vmem:[%s901_s0 + $0x38] sm:$0xff]  ;;  %v240_v38 = vld [vmem:[%s902_s1 + $0x10] sm:$0xff]  ;;  %v239_v39 = vld [vmem:[%s902_s1 + $0x8] sm:$0xff] }
  0x10   :  { %353 = vmatpush.msra.mxu0 %v243_v33  ;;  %609 = vmatpush.msra.mxu2 %v243_v33  ;;  %v27_v37 = vld [vmem:[%s901_s0 + $0x78] sm:$0xff]  ;;  %v238_v40 = vld [vmem:[%s902_s1] sm:$0xff]  ;;  %s662_s1 = smov [#allocation2]  }
  0x11   :  { %608 = vmatpush.msra.mxu1 %v243_v33  ;;  %610 = vmatpush.msra.mxu3 %v243_v33  ;;  %s524_s4 = sshll.u32 %s662_s1, 4  ;;  %s525_s4 = int_to_ptr.vmem [resolvable:$true] %s524_s4 }
  0x12   :  { %101 = vperm.xlu2 %633, %v30_v7   ;;  %354 = vmatpush.msra.mxu0 %v242_v34 }
  0x13   :  { %50 = vperm.xlu0 %631, %v13_v8   ;;  %74 = vperm.xlu1 %632, %v21_v9  }
  0x14   :  { %612 = vmatpush.msra.mxu2 %v242_v34  ;;  %611 = vmatpush.msra.mxu1 %v242_v34 }
  0x15   :  { %355 = vmatpush.msra.mxu0 %v241_v35  ;;  %613 = vmatpush.msra.mxu3 %v242_v34 }
  0x16   :  { %615 = vmatpush.msra.mxu2 %v241_v35  ;;  %614 = vmatpush.msra.mxu1 %v241_v35 }
  0x17   :  { %356 = vmatpush.msra.mxu0 %v240_v38  ;;  %616 = vmatpush.msra.mxu3 %v241_v35 }
  0x18   :  { %618 = vmatpush.msra.mxu2 %v240_v38  ;;  %617 = vmatpush.msra.mxu1 %v240_v38 }
  0x19   :  { %357 = vmatpush.msra.mxu0 %v239_v39  ;;  %619 = vmatpush.msra.mxu3 %v240_v38 }
  0x1a   :  { %77 = vperm.xlu2 %633, %v22_v10   ;;  %621 = vmatpush.msra.mxu2 %v239_v39 }
  0x1b   :  { %125 = vperm.xlu0 %631, %v38_v11   ;;  %53 = vperm.xlu1 %632, %v14_v12  }
  0x1c   :  { %620 = vmatpush.msra.mxu1 %v239_v39  ;;  %358 = vmatpush.msra.mxu0 %v238_v40 }
  0x1d   :  { %624 = vmatpush.msra.mxu2 %v238_v40  ;;  %622 = vmatpush.msra.mxu3 %v239_v39 }
  0x1e   :  { %623 = vmatpush.msra.mxu1 %v238_v40 }
  0x1f   :  { %625 = vmatpush.msra.mxu3 %v238_v40 }
  0x22   :  { %56 = vperm.xlu2 %633, %v15_v13  }
  0x23   :  { %104 = vperm.xlu0 %631, %v31_v14   ;;  %128 = vperm.xlu1 %632, %v39_v15  }
  0x2a   :  { %131 = vperm.xlu2 %633, %v40_v16  }
  0x2b   :  { %80 = vperm.xlu0 %631, %v23_v17   ;;  %107 = vperm.xlu1 %632, %v32_v18  }
  0x32   :  { %110 = vperm.xlu2 %633, %v33_v19  }
  0x33   :  { %59 = vperm.xlu0 %631, %v16_v20   ;;  %83 = vperm.xlu1 %632, %v24_v21  }
  0x3a   :  { %86 = vperm.xlu2 %633, %v25_v22  }
  0x3b   :  { %134 = vperm.xlu0 %631, %v41_v23   ;;  %62 = vperm.xlu1 %632, %v17_v24  }
  0x42   :  { %65 = vperm.xlu2 %633, %v18_v25  }
  0x43   :  { %113 = vperm.xlu0 %631, %v34_v26   ;;  %137 = vperm.xlu1 %632, %v42_v27  }
  0x4a   :  { %140 = vperm.xlu2 %633, %v43_v30  }
  0x4b   :  { %89 = vperm.xlu0 %631, %v26_v31   ;;  %116 = vperm.xlu1 %632, %v35_v32  }
  0x53   :  { %68 = vperm.xlu0 %631, %v19_v36   ;;  %92 = vperm.xlu1 %632, %v27_v37  }
  0x5c   :  { %v99_v41 = vpop.permute.xlu2 %98 }
  0x5d   :  { %vm159_vm3 = vcmp.eq.s32.totalorder %v800_v44, %v99_v41 }
  0x5e   :  { %v555_v54 = vsel %vm159_vm3, 1.0, %v661_v48 }
  0x64   :  { %v123_v42 = vpop.permute.xlu2 %122 }
  0x65   :  { %vm167_vm6 = vcmp.eq.s32.totalorder %v800_v44, %v123_v42 }
  0x66   :  { %v563_v61 = vsel %vm167_vm6, 1.0, %v661_v48 }
  0x6c   :  { %v102_v45 = vpop.permute.xlu2 %101 }
  0x6d   :  { %vm160_vm7 = vcmp.eq.s32.totalorder %v800_v44, %v102_v45 }
  0x6e   :  { %v556_v62 = vsel %vm160_vm7, 1.0, %v661_v48 }
  0x74   :  { %v78_v53 = vpop.permute.xlu2 %77 }
  0x75   :  { %v96_v46 = vpop.permute.xlu0 %95  ;;  %v48_v47 = vpop.permute.xlu1 %47  ;;  %vm152_vm10 = vcmp.eq.s32.totalorder %v800_v44, %v78_v53 }
  0x76   :  { %vm158_vm1 = vcmp.eq.s32.totalorder %v800_v44, %v96_v46  ;;  %vm142_vm2 = vcmp.eq.s32.totalorder %v800_v44, %v48_v47  ;;  %v548_v2 = vsel %vm152_vm10, 1.0, %v661_v48 }
  0x77   :  { %v554_v49 = vsel %vm158_vm1, 1.0, %v661_v48  ;;  %v538_v50 = vsel %vm142_vm2, 1.0, %v661_v48 }
  0x78   :  { %570 = vmatmul.msk.f32.vlgmr.msra.gmra.mxu0 %vm246_vm0, %v538_v50  ;;  %586 = vmatmul.msk.f32.vlgmr.msra.gmra.mxu2 %vm246_vm0, %v554_v49 }
  0x7c   :  { %v57_v63 = vpop.permute.xlu2 %56 }
  0x7d   :  { %v120_v51 = vpop.permute.xlu0 %119  ;;  %v72_v52 = vpop.permute.xlu1 %71  ;;  %vm145_vm13 = vcmp.eq.s32.totalorder %v800_v44, %v57_v63 }
  0x7e   :  { %vm166_vm4 = vcmp.eq.s32.totalorder %v800_v44, %v120_v51  ;;  %vm150_vm5 = vcmp.eq.s32.totalorder %v800_v44, %v72_v52  ;;  %v541_v8 = vsel %vm145_vm13, 1.0, %v661_v48 }
  0x7f   :  { %v562_v55 = vsel %vm166_vm4, 1.0, %v661_v48  ;;  %v546_v56 = vsel %vm150_vm5, 1.0, %v661_v48 }
  0x80   :  { %578 = vmatmul.msk.f32.vlgmr.msra.gmra.mxu1 %vm246_vm0, %v546_v56  ;;  %587 = vmatmul.msk.f32.gmra.mxu2 %vm246_vm0, %v555_v54 }
  0x81   :  { %594 = vmatmul.msk.f32.vlgmr.msra.gmra.mxu3 %vm246_vm0, %v562_v55 }
  0x84   :  { %v132_v5 = vpop.permute.xlu2 %131 }
  0x85   :  { %v51_v57 = vpop.permute.xlu0 %50  ;;  %v75_v58 = vpop.permute.xlu1 %74  ;;  %vm170_vm1 = vcmp.eq.s32.totalorder %v800_v44, %v132_v5 }
  0x86   :  { %vm143_vm8 = vcmp.eq.s32.totalorder %v800_v44, %v51_v57  ;;  %vm151_vm9 = vcmp.eq.s32.totalorder %v800_v44, %v75_v58  ;;  %v566_v16 = vsel %vm170_vm1, 1.0, %v661_v48 }
  0x87   :  { %v539_v59 = vsel %vm143_vm8, 1.0, %v661_v48  ;;  %v547_v60 = vsel %vm151_vm9, 1.0, %v661_v48 }
  0x88   :  { %571 = vmatmul.msk.f32.gmra.mxu0 %vm246_vm0, %v539_v59  ;;  %579 = vmatmul.msk.f32.gmra.mxu1 %vm246_vm0, %v547_v60 }
  0x89   :  { %588 = vmatmul.msk.f32.gmra.mxu2 %vm246_vm0, %v556_v62  ;;  %595 = vmatmul.msk.f32.gmra.mxu3 %vm246_vm0, %v563_v61 }
  0x8c   :  { %v111_v11 = vpop.permute.xlu2 %110 }
  0x8d   :  { %v126_v0 = vpop.permute.xlu0 %125  ;;  %v54_v1 = vpop.permute.xlu1 %53  ;;  %vm163_vm4 = vcmp.eq.s32.totalorder %v800_v44, %v111_v11 }
  0x8e   :  { %vm168_vm11 = vcmp.eq.s32.totalorder %v800_v44, %v126_v0  ;;  %vm144_vm12 = vcmp.eq.s32.totalorder %v800_v44, %v54_v1  ;;  %v559_v22 = vsel %vm163_vm4, 1.0, %v661_v48 }
  0x8f   :  { %v564_v3 = vsel %vm168_vm11, 1.0, %v661_v48  ;;  %v540_v4 = vsel %vm144_vm12, 1.0, %v661_v48 }
  0x90   :  { %572 = vmatmul.msk.f32.gmra.mxu0 %vm246_vm0, %v540_v4  ;;  %580 = vmatmul.msk.f32.gmra.mxu1 %vm246_vm0, %v548_v2 }
  0x91   :  { %596 = vmatmul.msk.f32.gmra.mxu3 %vm246_vm0, %v564_v3 }
  0x94   :  { %v87_v19 = vpop.permute.xlu2 %86 }
  0x95   :  { %v105_v6 = vpop.permute.xlu0 %104  ;;  %v129_v7 = vpop.permute.xlu1 %128  ;;  %vm155_vm7 = vcmp.eq.s32.totalorder %v800_v44, %v87_v19 }
  0x96   :  { %vm161_vm14 = vcmp.eq.s32.totalorder %v800_v44, %v105_v6  ;;  %vm169_vm15 = vcmp.eq.s32.totalorder %v800_v44, %v129_v7  ;;  %v551_v25 = vsel %vm155_vm7, 1.0, %v661_v48 }
  0x97   :  { %v557_v9 = vsel %vm161_vm14, 1.0, %v661_v48  ;;  %v565_v10 = vsel %vm169_vm15, 1.0, %v661_v48 }
  0x98   :  { %573 = vmatmul.msk.f32.gmra.mxu0 %vm246_vm0, %v541_v8  ;;  %589 = vmatmul.msk.f32.gmra.mxu2 %vm246_vm0, %v557_v9 }
  0x99   :  { %597 = vmatmul.msk.f32.gmra.mxu3 %vm246_vm0, %v565_v10 }
  0x9c   :  { %v66_v28 = vpop.permute.xlu2 %65 }
  0x9d   :  { %v81_v12 = vpop.permute.xlu0 %80  ;;  %v108_v13 = vpop.permute.xlu1 %107  ;;  %vm148_vm10 = vcmp.eq.s32.totalorder %v800_v44, %v66_v28 }
  0x9e   :  { %vm153_vm2 = vcmp.eq.s32.totalorder %v800_v44, %v81_v12  ;;  %vm162_vm3 = vcmp.eq.s32.totalorder %v800_v44, %v108_v13  ;;  %v544_v31 = vsel %vm148_vm10, 1.0, %v661_v48 }
  0x9f   :  { %v549_v14 = vsel %vm153_vm2, 1.0, %v661_v48  ;;  %v558_v15 = vsel %vm162_vm3, 1.0, %v661_v48 }
  0xa0   :  { %581 = vmatmul.msk.f32.gmra.mxu1 %vm246_vm0, %v549_v14  ;;  %590 = vmatmul.msk.f32.gmra.mxu2 %vm246_vm0, %v558_v15 }
  0xa1   :  { %598 = vmatmul.msk.f32.gmra.mxu3 %vm246_vm0, %v566_v16 }
  0xa4   :  { %v141_v34 = vpop.permute.xlu2 %140 }
  0xa5   :  { %v60_v17 = vpop.permute.xlu0 %59  ;;  %v84_v18 = vpop.permute.xlu1 %83  ;;  %vm173_vm13 = vcmp.eq.s32.totalorder %v800_v44, %v141_v34 }
  0xa6   :  { %vm146_vm5 = vcmp.eq.s32.totalorder %v800_v44, %v60_v17  ;;  %vm154_vm6 = vcmp.eq.s32.totalorder %v800_v44, %v84_v18  ;;  %v569_v39 = vsel %vm173_vm13, 1.0, %v661_v48 }
  0xa7   :  { %v542_v20 = vsel %vm146_vm5, 1.0, %v661_v48  ;;  %v550_v21 = vsel %vm154_vm6, 1.0, %v661_v48 }
  0xa8   :  { %574 = vmatmul.msk.f32.gmra.mxu0 %vm246_vm0, %v542_v20  ;;  %582 = vmatmul.msk.f32.gmra.mxu1 %vm246_vm0, %v550_v21 }
  0xa9   :  { %591 = vmatmul.msk.f32.gmra.mxu2 %vm246_vm0, %v559_v22 }
  0xad   :  { %v135_v23 = vpop.permute.xlu0 %134  ;;  %v63_v24 = vpop.permute.xlu1 %62 }
  0xae   :  { %vm171_vm8 = vcmp.eq.s32.totalorder %v800_v44, %v135_v23  ;;  %vm147_vm9 = vcmp.eq.s32.totalorder %v800_v44, %v63_v24 }
  0xaf   :  { %v567_v26 = vsel %vm171_vm8, 1.0, %v661_v48  ;;  %v543_v27 = vsel %vm147_vm9, 1.0, %v661_v48 }
  0xb0   :  { %575 = vmatmul.msk.f32.gmra.mxu0 %vm246_vm0, %v543_v27  ;;  %583 = vmatmul.msk.f32.gmra.mxu1 %vm246_vm0, %v551_v25 }
  0xb1   :  { %599 = vmatmul.msk.f32.gmra.mxu3 %vm246_vm0, %v567_v26 }
  0xb5   :  { %v114_v29 = vpop.permute.xlu0 %113  ;;  %v138_v30 = vpop.permute.xlu1 %137 }
  0xb6   :  { %vm164_vm11 = vcmp.eq.s32.totalorder %v800_v44, %v114_v29  ;;  %vm172_vm12 = vcmp.eq.s32.totalorder %v800_v44, %v138_v30 }
  0xb7   :  { %v560_v32 = vsel %vm164_vm11, 1.0, %v661_v48  ;;  %v568_v33 = vsel %vm172_vm12, 1.0, %v661_v48 }
  0xb8   :  { %576 = vmatmul.msk.f32.gmra.mxu0 %vm246_vm0, %v544_v31  ;;  %592 = vmatmul.msk.f32.gmra.mxu2 %vm246_vm0, %v560_v32 }
  0xb9   :  { %600 = vmatmul.msk.f32.gmra.mxu3 %vm246_vm0, %v568_v33 }
  0xbd   :  { %v90_v35 = vpop.permute.xlu0 %89  ;;  %v117_v36 = vpop.permute.xlu1 %116 }
  0xbe   :  { %vm156_vm14 = vcmp.eq.s32.totalorder %v800_v44, %v90_v35  ;;  %vm165_vm15 = vcmp.eq.s32.totalorder %v800_v44, %v117_v36 }
  0xbf   :  { %v552_v37 = vsel %vm156_vm14, 1.0, %v661_v48  ;;  %v561_v38 = vsel %vm165_vm15, 1.0, %v661_v48 }
  0xc0   :  { %584 = vmatmul.msk.f32.gmra.mxu1 %vm246_vm0, %v552_v37  ;;  %593 = vmatmul.msk.f32.gmra.mxu2 %vm246_vm0, %v561_v38 }
  0xc1   :  { %601 = vmatmul.msk.f32.gmra.mxu3 %vm246_vm0, %v569_v39 }
  0xc5   :  { %v69_v40 = vpop.permute.xlu0 %68  ;;  %v93_v41 = vpop.permute.xlu1 %92 }
  0xc6   :  { %vm149_vm1 = vcmp.eq.s32.totalorder %v800_v44, %v69_v40  ;;  %vm157_vm2 = vcmp.eq.s32.totalorder %v800_v44, %v93_v41 }
  0xc7   :  { %v545_v42 = vsel %vm149_vm1, 1.0, %v661_v48  ;;  %v553_v43 = vsel %vm157_vm2, 1.0, %v661_v48 }
  0xc8   :  { %577 = vmatmul.msk.f32.gmra.mxu0 %vm246_vm0, %v545_v42  ;;  %585 = vmatmul.msk.f32.gmra.mxu1 %vm246_vm0, %v553_v43 }
  0xf5   :  { %v360_v45 = vpop.f32.mrf.mxu0 }
  0xf6   :  { %v456_v46 = vmul.f32 11.313708, %v360_v45 }
  0xf8   :  { %488 = vst [vmem:[#allocation2] sm:$0xff] %v456_v46 }
  0xfb   :  { %v408_v47 = vpop.f32.mrf.mxu2 }
  0xfc   :  { %v472_v49 = vmul.f32 11.313708, %v408_v47 }
  0xfd   :  { %v384_v50 = vpop.f32.mrf.mxu1 }
  0xfe   :  { %504 = vst [vmem:[#allocation2 + $0x80] sm:$0xff] %v472_v49  ;;  %v464_v51 = vmul.f32 11.313708, %v384_v50 }
 0x100   :  { %496 = vst [vmem:[#allocation2 + $0x40] sm:$0xff] %v464_v51 }
 0x103   :  { %v411_v52 = vpop.f32.mrf.mxu2 }
 0x104   :  { %v473_v53 = vmul.f32 11.313708, %v411_v52  ;;  %v432_v44 = vpop.f32.mrf.mxu3 }
 0x105   :  { %v480_v54 = vmul.f32 11.313708, %v432_v44  ;;  %v363_v55 = vpop.f32.mrf.mxu0  ;;  %v387_v56 = vpop.f32.mrf.mxu1 }
 0x106   :  { %505 = vst [vmem:[#allocation2 + $0x88] sm:$0xff] %v473_v53  ;;  %v457_v48 = vmul.f32 11.313708, %v363_v55  ;;  %v465_v57 = vmul.f32 11.313708, %v387_v56 }
 0x107   :  { %512 = vst [vmem:[#allocation2 + $0xc0] sm:$0xff] %v480_v54 }
 0x108   :  { %489 = vst [vmem:[#allocation2 + $0x8] sm:$0xff] %v457_v48 }
 0x109   :  { %497 = vst [vmem:[#allocation2 + $0x48] sm:$0xff] %v465_v57 }
 0x10c   :  { %v414_v58 = vpop.f32.mrf.mxu2  ;;  %v435_v59 = vpop.f32.mrf.mxu3 }
 0x10d   :  { %v474_v60 = vmul.f32 11.313708, %v414_v58  ;;  %v481_v61 = vmul.f32 11.313708, %v435_v59  ;;  %v366_v62 = vpop.f32.mrf.mxu0  ;;  %v390_v63 = vpop.f32.mrf.mxu1 }
 0x10e   :  { %v458_v0 = vmul.f32 11.313708, %v366_v62  ;;  %v466_v1 = vmul.f32 11.313708, %v390_v63 }
 0x10f   :  { %506 = vst [vmem:[#allocation2 + $0x90] sm:$0xff] %v474_v60 }
 0x110   :  { %513 = vst [vmem:[#allocation2 + $0xc8] sm:$0xff] %v481_v61 }
 0x111   :  { %490 = vst [vmem:[#allocation2 + $0x10] sm:$0xff] %v458_v0 }
 0x112   :  { %498 = vst [vmem:[#allocation2 + $0x50] sm:$0xff] %v466_v1 }
 0x114   :  { %v438_v2 = vpop.f32.mrf.mxu3 }
 0x115   :  { %v482_v3 = vmul.f32 11.313708, %v438_v2  ;;  %v369_v4 = vpop.f32.mrf.mxu0 }
 0x116   :  { %v459_v5 = vmul.f32 11.313708, %v369_v4 }
 0x117   :  { %514 = vst [vmem:[#allocation2 + $0xd0] sm:$0xff] %v482_v3 }
 0x118   :  { %491 = vst [vmem:[#allocation2 + $0x18] sm:$0xff] %v459_v5 }
 0x11b   :  { %v417_v6 = vpop.f32.mrf.mxu2 }
 0x11c   :  { %v475_v7 = vmul.f32 11.313708, %v417_v6  ;;  %v441_v8 = vpop.f32.mrf.mxu3 }
 0x11d   :  { %v483_v9 = vmul.f32 11.313708, %v441_v8  ;;  %v393_v10 = vpop.f32.mrf.mxu1 }
 0x11e   :  { %507 = vst [vmem:[#allocation2 + $0x98] sm:$0xff] %v475_v7  ;;  %v467_v11 = vmul.f32 11.313708, %v393_v10 }
 0x11f   :  { %515 = vst [vmem:[#allocation2 + $0xd8] sm:$0xff] %v483_v9 }
 0x120   :  { %499 = vst [vmem:[#allocation2 + $0x58] sm:$0xff] %v467_v11 }
 0x123   :  { %v420_v12 = vpop.f32.mrf.mxu2 }
 0x124   :  { %v476_v13 = vmul.f32 11.313708, %v420_v12  ;;  %v444_v14 = vpop.f32.mrf.mxu3 }
 0x125   :  { %v484_v15 = vmul.f32 11.313708, %v444_v14  ;;  %v372_v16 = vpop.f32.mrf.mxu0  ;;  %v396_v17 = vpop.f32.mrf.mxu1 }
 0x126   :  { %508 = vst [vmem:[#allocation2 + $0xa0] sm:$0xff] %v476_v13  ;;  %v460_v18 = vmul.f32 11.313708, %v372_v16  ;;  %v468_v19 = vmul.f32 11.313708, %v396_v17 }
 0x127   :  { %516 = vst [vmem:[#allocation2 + $0xe0] sm:$0xff] %v484_v15 }
 0x128   :  { %492 = vst [vmem:[#allocation2 + $0x20] sm:$0xff] %v460_v18 }
 0x129   :  { %500 = vst [vmem:[#allocation2 + $0x60] sm:$0xff] %v468_v19 }
 0x12c   :  { %v423_v20 = vpop.f32.mrf.mxu2 }
 0x12d   :  { %v477_v21 = vmul.f32 11.313708, %v423_v20  ;;  %v375_v22 = vpop.f32.mrf.mxu0  ;;  %v399_v23 = vpop.f32.mrf.mxu1 }
 0x12e   :  { %v461_v24 = vmul.f32 11.313708, %v375_v22  ;;  %v469_v25 = vmul.f32 11.313708, %v399_v23 }
 0x12f   :  { %509 = vst [vmem:[#allocation2 + $0xa8] sm:$0xff] %v477_v21 }
 0x130   :  { %493 = vst [vmem:[#allocation2 + $0x28] sm:$0xff] %v461_v24 }
 0x131   :  { %501 = vst [vmem:[#allocation2 + $0x68] sm:$0xff] %v469_v25 }
 0x134   :  { %v447_v26 = vpop.f32.mrf.mxu3 }
 0x135   :  { %v485_v27 = vmul.f32 11.313708, %v447_v26  ;;  %v378_v28 = vpop.f32.mrf.mxu0 }
 0x136   :  { %v462_v29 = vmul.f32 11.313708, %v378_v28 }
 0x137   :  { %517 = vst [vmem:[#allocation2 + $0xe8] sm:$0xff] %v485_v27 }
 0x138   :  { %494 = vst [vmem:[#allocation2 + $0x30] sm:$0xff] %v462_v29 }
 0x13b   :  { %v426_v30 = vpop.f32.mrf.mxu2 }
 0x13c   :  { %v478_v31 = vmul.f32 11.313708, %v426_v30  ;;  %v450_v32 = vpop.f32.mrf.mxu3 }
 0x13d   :  { %v486_v33 = vmul.f32 11.313708, %v450_v32  ;;  %v402_v34 = vpop.f32.mrf.mxu1 }
 0x13e   :  { %510 = vst [vmem:[#allocation2 + $0xb0] sm:$0xff] %v478_v31  ;;  %v470_v35 = vmul.f32 11.313708, %v402_v34 }
 0x13f   :  { %518 = vst [vmem:[#allocation2 + $0xf0] sm:$0xff] %v486_v33 }
 0x140   :  { %502 = vst [vmem:[#allocation2 + $0x70] sm:$0xff] %v470_v35 }
 0x143   :  { %v429_v36 = vpop.f32.mrf.mxu2 }
 0x144   :  { %v479_v37 = vmul.f32 11.313708, %v429_v36  ;;  %v453_v38 = vpop.f32.mrf.mxu3 }
 0x145   :  { %v487_v39 = vmul.f32 11.313708, %v453_v38  ;;  %v381_v40 = vpop.f32.mrf.mxu0  ;;  %v405_v41 = vpop.f32.mrf.mxu1 }
 0x146   :  { %511 = vst [vmem:[#allocation2 + $0xb8] sm:$0xff] %v479_v37  ;;  %v463_v42 = vmul.f32 11.313708, %v381_v40  ;;  %v471_v43 = vmul.f32 11.313708, %v405_v41 }
 0x147   :  { %519 = vst [vmem:[#allocation2 + $0xf8] sm:$0xff] %v487_v39 }
 0x148   :  { %495 = vst [vmem:[#allocation2 + $0x38] sm:$0xff] %v463_v42 }
 0x149   :  { %503 = vst [vmem:[#allocation2 + $0x78] sm:$0xff] %v471_v43 }
 0x14a   :  { %532 = dma.vmem_to_hbm [thread:$0]  %s525_s4, 4096, %s527_s7, [#allocation3], %s663_s8, %s663_s8, %s664_s9  }
 0x14b   :  { %658 = dma.done.wait [#allocation3], 4096  }
 0x14c   :  { %659 = vsyncadd [#allocation3], 4294963200 }
 0x14d   :  { %537 = vsyncpa [#allocation3], 1 }

</bundles_post_ra>
